<compile_context>
chip_gen: v7x
topology: tpu7x:2x2x1
jax: 0.10.0
libtpu: 0.0.40
codegen_flags: <defaults>
</compile_context>

<pallas_src>
import functools
import math

import jax
import jax.numpy as jnp
from jax.experimental import pallas as pl
from jax.experimental.pallas import tpu as pltpu

# -log(1e-4): log of the clamped "cold" one-hot entries, hoisted to a constant.
_NEG_LOG_LABEL_MIN = -math.log(1e-4)


def _round_up(x, m):
    return -(-x // m) * m


def _choose_tile_n(n, c, itemsize):
    """Pick the per-step column (batch) tile size from a VMEM budget."""
    c_pad = _round_up(c, 8)  # f32 sublane packing of the (C, TN) temporaries
    # Per-column VMEM bytes:
    #   2 double-buffered, 128-lane-padded (TN, C) input staging blocks
    #   + ~6 live f32 (C_pad, TN) temporaries (pred_t, z, ez, mask, ...)
    #   + double-buffered int32 labels row.
    per_col = 2 * 128 * itemsize + 6 * 4 * c_pad + 2 * 4
    budget = 16 * 1024 * 1024            # headroom inside the 32 MiB scoped limit
    cap = (budget // per_col) // 128 * 128
    # The (TN, C) staging block is lane-padded to 128 in VMEM, so cap columns
    # harder for wide dtypes (~8K f32 / ~16K bf16 keeps v7x's 64 MiB happy).
    cap = max(128, min(cap, 8192 * max(1, 4 // itemsize)))
    if n <= 256:
        return n                          # single full-extent tile
    if n <= cap:
        # Would fit in one tile: split into >=2 grid steps so both v7x
        # TensorCores get work (neutral on single-TC v5e/v6e).
        return min(cap, _round_up(_round_up(n, 2) // 2, 128))
    return cap


def _sce_kernel(pred_ref, labels_ref, out_ref, *, n, tile_n, num_classes):
    """One batch-tile of SCE partial sums.

    pred_ref:   (TN, C) logits in their input dtype (f32 or bf16).
    labels_ref: (1, TN) int32 class ids.
    out_ref:    (1, 2, 1) f32 -> [ce_partial_sum, rce_partial_sum].
    """
    i = pl.program_id(0)
    c = num_classes

    pred = pred_ref[...]                                   # (TN, C)
    labels = labels_ref[...]                               # (1, TN)

    # Lane-dense transpose on the (otherwise idle) MXU: eye @ pred^T -> (C, TN) f32.
    rows = jax.lax.broadcasted_iota(jnp.int32, (c, c), 0)
    cols = jax.lax.broadcasted_iota(jnp.int32, (c, c), 1)
    eye = (rows == cols).astype(pred.dtype)
    pred_t = jax.lax.dot_general(
        eye, pred, (((1,), (1,)), ((), ())),               # NT gemm: eye @ pred^T
        preferred_element_type=jnp.float32)                # (C, TN) f32

    # One-hot membership: (C, 1) iota broadcast against the (1, TN) labels row.
    class_ids = jax.lax.broadcasted_iota(jnp.int32, (c, 1), 0)
    is_hot = class_ids == labels                           # (C, TN) bool

    # Log-softmax pieces, reduced over the class (sublane) axis.
    m = jnp.max(pred_t, axis=0, keepdims=True)             # (1, TN)
    z = pred_t - m                                         # (C, TN)
    ez = jnp.exp(z)                                        # (C, TN)  EUP
    sez = jnp.sum(ez, axis=0, keepdims=True)               # (1, TN)

    # Cross entropy per column: -(z[label] - log(sez)).
    z_hot = jnp.sum(jnp.where(is_hot, z, 0.0), axis=0, keepdims=True)
    ce_col = jnp.log(sez) - z_hot                          # (1, TN)

    # Reverse cross entropy per column:
    #   -sum_j clip(softmax_j, 1e-7, 1) * log(clip(onehot_j, 1e-4, 1))
    #   = -log(1e-4) * sum_{j != label} max(softmax_j, 1e-7)
    #   = -log(1e-4) * (sum_j max(ez_j, 1e-7*sez) - max(exp(z_hot), 1e-7*sez)) / sez
    thresh = 1e-7 * sez                                    # (1, TN)
    sum_clip = jnp.sum(jnp.maximum(ez, thresh), axis=0, keepdims=True)
    hot_clip = jnp.maximum(jnp.exp(z_hot), thresh)         # per-column EUP exp
    inv_sez = pl.reciprocal(sez, approx=True)              # one EUP recip per column
    rce_col = _NEG_LOG_LABEL_MIN * ((sum_clip - hot_clip) * inv_sez)

    # Ragged last tile: per-column masks only (padded-column garbage never mixes
    # across columns, and the selects discard any inf/nan it produced).
    if (n % tile_n) != 0:
        col = jax.lax.broadcasted_iota(jnp.int32, (1, tile_n), 1)
        valid = (col + i * tile_n) < n                     # (1, TN)
        ce_col = jnp.where(valid, ce_col, 0.0)
        rce_col = jnp.where(valid, rce_col, 0.0)

    ce_s = jnp.sum(ce_col, axis=1, keepdims=True)          # (1, 1)
    rce_s = jnp.sum(rce_col, axis=1, keepdims=True)        # (1, 1)
    out_ref[...] = jnp.concatenate([ce_s, rce_s], axis=0).reshape(1, 2, 1)


def sce_loss(pred, labels, *, dataset="cifar10", num_classes=10, tile_n=None):
    """Symmetric Cross Entropy loss. pred: (N, C) float (f32 or bf16), labels: (N,) int."""
    if dataset == "cifar10":
        alpha, beta = 0.1, 1.0
    elif dataset == "cifar100":
        alpha, beta = 6.0, 0.1
    else:
        raise ValueError(dataset)

    n, c = pred.shape
    assert c == num_classes

    if tile_n is None:
        tile_n = _choose_tile_n(n, c, pred.dtype.itemsize)
    num_tiles = pl.cdiv(n, tile_n)

    labels_2d = labels.astype(jnp.int32).reshape(1, n)     # free reshape, no copy

    kernel = functools.partial(_sce_kernel, n=n, tile_n=tile_n, num_classes=c)

    parts = pl.pallas_call(
        kernel,
        out_shape=jax.ShapeDtypeStruct((num_tiles, 2, 1), jnp.float32),
        grid=(num_tiles,),
        in_specs=[
            pl.BlockSpec((tile_n, c), lambda i: (i, 0)),    # natural (N, C) layout
            pl.BlockSpec((1, tile_n), lambda i: (0, i)),
        ],
        out_specs=pl.BlockSpec((1, 2, 1), lambda i: (i, 0, 0)),
        compiler_params=pltpu.CompilerParams(
            dimension_semantics=("parallel",),              # 2x on v7x dual-TC
            vmem_limit_bytes=32 * 1024 * 1024,
        ),
    )(pred, labels_2d)

    sums = jnp.sum(parts, axis=0)                           # (2, 1) tiny partials
    inv_n = 1.0 / n
    return alpha * (sums[0, 0] * inv_n) + beta * (sums[1, 0] * inv_n)


def _reference(pred, labels, *, alpha, beta, num_classes):
    # Pure-JAX reference mirroring the PyTorch module.
    pred = pred.astype(jnp.float32)
    logp = jax.nn.log_softmax(pred, axis=1)
    ce = -jnp.mean(jnp.take_along_axis(logp, labels[:, None], axis=1))
    sm = jnp.clip(jax.nn.softmax(pred, axis=1), 1e-7, 1.0)
    oh = jnp.clip(jax.nn.one_hot(labels, num_classes), 1e-4, 1.0)
    rce = -jnp.sum(sm * jnp.log(oh), axis=1)
    return alpha * ce + beta * jnp.mean(rce)


if __name__ == "__main__":
    key = jax.random.PRNGKey(0)
    k1, k2, k3, k4, k5, k6 = jax.random.split(key, 6)

    # Case 1: CIFAR-10 shaped, f32, single full-extent tile.
    n1, c1 = 32, 10
    pred1 = jax.random.normal(k1, (n1, c1), dtype=jnp.float32)
    labels1 = jax.random.randint(k2, (n1,), 0, c1, dtype=jnp.int32)
    loss1 = jax.block_until_ready(
        sce_loss(pred1, labels1, dataset="cifar10", num_classes=c1))
    ref1 = _reference(pred1, labels1, alpha=0.1, beta=1.0, num_classes=c1)
    # Tolerance loosened slightly vs f64: pl.reciprocal(approx=True) in the RCE path.
    assert jnp.allclose(loss1, ref1, rtol=5e-3, atol=5e-3), (loss1, ref1)

    # Case 2: CIFAR-100 shaped, bf16 logits, default tiling -> 2 parallel grid
    # steps with a ragged last tile (exercises the masked-remainder path).
    n2, c2 = 300, 100
    pred2 = jax.random.normal(k3, (n2, c2), dtype=jnp.float32).astype(jnp.bfloat16)
    labels2 = jax.random.randint(k4, (n2,), 0, c2, dtype=jnp.int32)
    loss2 = jax.block_until_ready(
        sce_loss(pred2, labels2, dataset="cifar100", num_classes=c2))
    ref2 = _reference(pred2.astype(jnp.float32), labels2,
                      alpha=6.0, beta=0.1, num_classes=c2)
    assert jnp.allclose(loss2, ref2, rtol=5e-3, atol=5e-3), (loss2, ref2)

    # Case 3: forced small tiles -> 3 grid steps with a ragged tail (C=10 path).
    n3, c3 = 700, 10
    pred3 = jax.random.normal(k5, (n3, c3), dtype=jnp.float32)
    labels3 = jax.random.randint(k6, (n3,), 0, c3, dtype=jnp.int32)
    loss3 = jax.block_until_ready(
        sce_loss(pred3, labels3, dataset="cifar10", num_classes=c3, tile_n=256))
    ref3 = _reference(pred3, labels3, alpha=0.1, beta=1.0, num_classes=c3)
    assert jnp.allclose(loss3, ref3, rtol=5e-3, atol=5e-3), (loss3, ref3)

    print("KERNEL_OK")
</pallas_src>

<mosaic_0001>
module attributes {stable_mosaic.version = 11 : i64} {
  func.func @_sce_kernel(%arg0: i32, %arg1: memref<32x10xf32, #tpu.memory_space<vmem>>, %arg2: memref<1x32xi32, #tpu.memory_space<vmem>>, %arg3: memref<1x2x1xf32, #tpu.memory_space<vmem>>) attributes {dimension_semantics = [#tpu.dimension_semantics<parallel>], iteration_bounds = array<i64: 1>, scalar_prefetch = 0 : i64, scratch_operands = 0 : i64, tpu.core_type = #tpu.core_type<tc>, window_params = [{transform_indices = @transform_0, window_bounds = array<i64: 32, 10>}, {transform_indices = @transform_1, window_bounds = array<i64: 1, 32>}, {transform_indices = @transform_2, window_bounds = array<i64: 1, 2, 1>}]} {
    %c0 = arith.constant 0 : index
    %c0_0 = arith.constant 0 : index
    %0 = vector.load %arg1[%c0, %c0_0] : memref<32x10xf32, #tpu.memory_space<vmem>>, vector<32x10xf32>
    %c0_1 = arith.constant 0 : index
    %c0_2 = arith.constant 0 : index
    %1 = vector.load %arg2[%c0_1, %c0_2] : memref<1x32xi32, #tpu.memory_space<vmem>>, vector<1x32xi32>
    %2 = tpu.iota {dimensions = array<i32: 0>} : vector<10x10xi32>
    %3 = tpu.iota {dimensions = array<i32: 1>} : vector<10x10xi32>
    %4 = arith.cmpi eq, %2, %3 : vector<10x10xi32>
    %5 = arith.extui %4 : vector<10x10xi1> to vector<10x10xi32>
    %6 = arith.sitofp %5 : vector<10x10xi32> to vector<10x10xf32>
    %cst = arith.constant dense<0.000000e+00> : vector<10x32xf32>
    %7 = tpu.matmul %6, %0, %cst {dimension_numbers = #tpu.dot_dimension_numbers<[1], [1], [0], [0], [0, 0, 1, 0], [], []>} : vector<10x10xf32>, vector<32x10xf32>, vector<10x32xf32> -> vector<10x32xf32>
    %8 = tpu.iota {dimensions = array<i32: 0>} : vector<10x1xi32>
    %9 = vector.broadcast %8 : vector<10x1xi32> to vector<10x32xi32>
    %10 = vector.broadcast %1 : vector<1x32xi32> to vector<10x32xi32>
    %11 = arith.cmpi eq, %9, %10 : vector<10x32xi32>
    %cst_3 = arith.constant dense<0xFF800000> : vector<32xf32>
    %12 = vector.multi_reduction <maximumf>, %7, %cst_3 [0] : vector<10x32xf32> to vector<32xf32>
    %13 = vector.shape_cast %12 : vector<32xf32> to vector<1x32xf32>
    %14 = vector.broadcast %13 : vector<1x32xf32> to vector<10x32xf32>
    %15 = arith.subf %7, %14 : vector<10x32xf32>
    %16 = math.exp %15 : vector<10x32xf32>
    %cst_4 = arith.constant dense<0.000000e+00> : vector<32xf32>
    %17 = vector.multi_reduction <add>, %16, %cst_4 [0] : vector<10x32xf32> to vector<32xf32>
    %18 = vector.shape_cast %17 : vector<32xf32> to vector<1x32xf32>
    %cst_5 = arith.constant 0.000000e+00 : f32
    %19 = vector.broadcast %cst_5 : f32 to vector<10x32xf32>
    %20 = arith.select %11, %15, %19 : vector<10x32xi1>, vector<10x32xf32>
    %cst_6 = arith.constant dense<0.000000e+00> : vector<32xf32>
    %21 = vector.multi_reduction <add>, %20, %cst_6 [0] : vector<10x32xf32> to vector<32xf32>
    %22 = vector.shape_cast %21 : vector<32xf32> to vector<1x32xf32>
    %23 = math.log %18 : vector<1x32xf32>
    %24 = arith.subf %23, %22 : vector<1x32xf32>
    %cst_7 = arith.constant 1.000000e-07 : f32
    %25 = vector.broadcast %cst_7 : f32 to vector<1x32xf32>
    %26 = arith.mulf %25, %18 : vector<1x32xf32>
    %27 = vector.broadcast %26 : vector<1x32xf32> to vector<10x32xf32>
    %28 = arith.maximumf %16, %27 : vector<10x32xf32>
    %cst_8 = arith.constant dense<0.000000e+00> : vector<32xf32>
    %29 = vector.multi_reduction <add>, %28, %cst_8 [0] : vector<10x32xf32> to vector<32xf32>
    %30 = vector.shape_cast %29 : vector<32xf32> to vector<1x32xf32>
    %31 = math.exp %22 : vector<1x32xf32>
    %32 = arith.maximumf %31, %26 : vector<1x32xf32>
    %33 = tpu.reciprocal %18 {approx = true} : vector<1x32xf32> -> vector<1x32xf32>
    %34 = arith.subf %30, %32 : vector<1x32xf32>
    %35 = arith.mulf %34, %33 : vector<1x32xf32>
    %cst_9 = arith.constant 9.21034049 : f32
    %36 = vector.broadcast %cst_9 : f32 to vector<1x32xf32>
    %37 = arith.mulf %36, %35 : vector<1x32xf32>
    %cst_10 = arith.constant dense<0.000000e+00> : vector<1xf32>
    %38 = vector.multi_reduction <add>, %24, %cst_10 [1] : vector<1x32xf32> to vector<1xf32>
    %39 = vector.shape_cast %38 : vector<1xf32> to vector<1x1xf32>
    %cst_11 = arith.constant dense<0.000000e+00> : vector<1xf32>
    %40 = vector.multi_reduction <add>, %37, %cst_11 [1] : vector<1x32xf32> to vector<1xf32>
    %41 = vector.shape_cast %40 : vector<1xf32> to vector<1x1xf32>
    %42 = tpu.concatenate %39, %41 in 0 : vector<1x1xf32>, vector<1x1xf32> -> vector<2x1xf32>
    %43 = vector.shape_cast %42 : vector<2x1xf32> to vector<1x2x1xf32>
    %c0_12 = arith.constant 0 : index
    %c0_13 = arith.constant 0 : index
    %c0_14 = arith.constant 0 : index
    %44 = vector.load %arg3[%c0_12, %c0_13, %c0_14] : memref<1x2x1xf32, #tpu.memory_space<vmem>>, vector<1x2x1xf32>
    tpu.vector_store %arg3[%c0_12, %c0_13, %c0_14], %43 {strides = array<i32>} : memref<1x2x1xf32, #tpu.memory_space<vmem>>, vector<1x2x1xf32>,
    return
  }
  func.func @transform_0(%arg0: i32) -> (i32, i32) {
    %c0_i32 = arith.constant 0 : i32
    %c0_i32_0 = arith.constant 0 : i32
    return %arg0, %c0_i32 : i32, i32
  }
  func.func @transform_1(%arg0: i32) -> (i32, i32) {
    %c0_i32 = arith.constant 0 : i32
    %c0_i32_0 = arith.constant 0 : i32
    return %c0_i32, %arg0 : i32, i32
  }
  func.func @transform_2(%arg0: i32) -> (i32, i32, i32) {
    %c0_i32 = arith.constant 0 : i32
    %c0_i32_0 = arith.constant 0 : i32
    %c0_i32_1 = arith.constant 0 : i32
    return %arg0, %c0_i32, %c0_i32_0 : i32, i32, i32
  }
}

</mosaic_0001>

<bundles_post_ra>
// kernel: tpu_custom_call.1
= control target key start
LH: loop header
LB: loop body
LE: loop exit
PB: predicated region body
PF: predicated region fallthrough
CT: control target
= control target key end

     0   :  { %vm27_vm0 = vcmask 80896   ;;  %v16_v0 = vlaneseq  ;;  %v249_v9 = vmov 0.0   ;;  %vm129_vm4 = vcmask 254976   ;;  %s297_s0 = inlined_call_operand.vmem [shape: f32[32,10], index: 0, kind: input, shape index: {}]   ;;  %s298_s1 = inlined_call_operand.vmem [shape: s32[1,32], index: 1, kind: input, shape index: {}]   ;;  %s299_s2 = inlined_call_operand.vmem [shape: f32[1,2,1], index: 2, kind: output, shape index: {}]  }
   0x1   :  { %v11_v1 = vld [vmem:[%s297_s0] sm:$0xff]  ;;  %v12_v2 = vld [vmem:[%s297_s0 + $0x8] sm:$0xff]  ;;  %vm227_vm1 = vmpackc.low %vm27_vm0, %vm27_vm0  ;;  %vm127_vm5 = vcmask 261120   ;;  %vm192_vm8 = vcmask 1040384   ;;  %vm194_vm9 = vcmask 1024  }
   0x2   :  { %v226_v3 = vpack.c.bf16 %v12_v2, %v11_v1  ;;  %v13_v4 = vld [vmem:[%s297_s0 + $0x10] sm:$0xff]  ;;  %v14_v5 = vld [vmem:[%s297_s0 + $0x18] sm:$0xff]  ;;  %v17_v6 = vshrl.u32 %v16_v0, 7  ;;  %v20_v7 = vand.u32 127, %v16_v0  ;;  %v208_v22 = vld [vmem:[%s298_s1] ss:$0 sm:$0xff] }
   0x3   :  { %v232_v8 = vpack.c.bf16 %v14_v5, %v13_v4 }
   0x4   :  { %228 = vmatprep.subr.msk.bf16.mxu0 %vm227_vm1, %v226_v3  ;;  %vm21_vm2 = vcmp.eq.s32.totalorder %v17_v6, %v20_v7  ;;  %v18_v11 = vadd.s32 8, %v17_v6  ;;  %vm125_vm6 = vcmp.eq.s32.totalorder %v17_v6, %v208_v22 }
   0x5   :  { %231 = vmatpush3.bf16.xpose.msk.msra.mxu0 %vm227_vm1, %v226_v3  ;;  %v200_v10 = vsel %vm21_vm2, 1.0, %v249_v9 }
   0x6   :  { %234 = vmatprep.subr.msk.bf16.mxu0 %vm227_vm1, %v232_v8  ;;  %223 = vmatprep.mubr.msk.f32.mxu0 %vm27_vm0, %v200_v10  ;;  %vm22_vm3 = vcmp.eq.s32.totalorder %v18_v11, %v20_v7  ;;  %vm126_vm7 = vcmp.eq.s32.totalorder %v18_v11, %v208_v22 }
   0x7   :  { %v201_v12 = vsel %vm22_vm3, 1.0, %v249_v9 }
   0xd   :  { %237 = vmatpush3.bf16.xpose.msk.msra.mxu0 %vm227_vm1, %v232_v8 }
  0x14   :  { %224 = vmatmul.mubr.msk.f32.vlgmr.msra.gmra.mrb[0].mxu0 %vm27_vm0, %v201_v12 }
  0xe7   :  { %v225_v13 = vpop.f32.mrb[0].mxu0 }
  0xe8   :  { %v130_v14 = vsel %vm129_vm4, %v225_v13, -inf  ;;  %v112_v15 = vpop.f32.mrb[1].mxu0 }
  0xe9   :  { %v128_v16 = vsel %vm127_vm5, %v112_v15, -inf }
  0xea   :  { %v131_v17 = vmax.f32 %v128_v16, %v130_v14 }
  0xec   :  { %v132_v18 = vrot.slane %v131_v17, 4 }
  0xee   :  { %v133_v19 = vmax.f32 %v131_v17, %v132_v18 }
  0xf0   :  { %v134_v20 = vrot.slane %v133_v19, 2 }
  0xf2   :  { %v135_v21 = vmax.f32 %v133_v19, %v134_v20 }
  0xf4   :  { %v136_v23 = vrot.slane %v135_v21, 1 }
  0xf6   :  { %v137_v24 = vmax.f32 %v135_v21, %v136_v23 }
  0xf8   :  { %v138_v25 = vsub.f32 %v112_v15, %v137_v24  ;;  %v139_v26 = vsub.f32 %v225_v13, %v137_v24 }
  0xfa   :  { %v140_v27 = vmul.f32 1.442695, %v138_v25  ;;  %v142_v28 = vmul.f32 1.442695, %v139_v26  ;;  %v153_v29 = vsel %vm125_vm6, %v138_v25, 0.0  ;;  %v154_v30 = vsel %vm126_vm7, %v139_v26, 0.0 }
  0xfb   :  { %v155_v31 = vsel %vm127_vm5, %v153_v29, 0.0  ;;  %v156_v32 = vsel %vm129_vm4, %v154_v30, 0.0 }
  0xfc   :  { %239 = vpow2.f32 %v140_v27  ;;  %v157_v33 = vadd.f32 %v156_v32, %v155_v31 }
  0xfd   :  { %241 = vpow2.f32 %v142_v28 }
  0xfe   :  { %v158_v34 = vrot.slane %v157_v33, 4 }
 0x100   :  { %v159_v35 = vadd.f32 %v158_v34, %v157_v33 }
 0x102   :  { %v160_v36 = vrot.slane %v159_v35, 2 }
 0x104   :  { %v161_v37 = vadd.f32 %v160_v36, %v159_v35 }
 0x106   :  { %v240_v38 = vpop.eup %239  ;;  %v162_v39 = vrot.slane %v161_v37, 1 }
 0x107   :  { %v242_v40 = vpop.eup %241  ;;  %v144_v41 = vsel %vm127_vm5, %v240_v38, 0.0 }
 0x108   :  { %v145_v42 = vsel %vm129_vm4, %v242_v40, 0.0  ;;  %v163_v43 = vadd.f32 %v162_v39, %v161_v37 }
 0x109   :  { %v146_v44 = vadd.f32 %v145_v42, %v144_v41 }
 0x10a   :  { %v179_v45 = vmul.f32 1.442695, %v163_v43 }
 0x10b   :  { %v147_v46 = vrot.slane %v146_v44, 4 }
 0x10c   :  { %243 = vpow2.f32 %v179_v45 }
 0x10d   :  { %v148_v47 = vadd.f32 %v147_v46, %v146_v44 }
 0x10f   :  { %v149_v48 = vrot.slane %v148_v47, 2 }
 0x111   :  { %v150_v49 = vadd.f32 %v149_v48, %v148_v47 }
 0x113   :  { %v151_v50 = vrot.slane %v150_v49, 1 }
 0x115   :  { %v152_v51 = vadd.f32 %v151_v50, %v150_v49 }
 0x116   :  { %v244_v52 = vpop.eup %243 }
 0x117   :  { %245 = vlog2.f32 %v152_v51  ;;  %v167_v53 = vmul.f32 1e-07, %v152_v51 }
 0x118   :  { %247 = vrcp.f32 %v152_v51 }
 0x119   :  { %v168_v54 = vmax.f32 %v240_v38, %v167_v53  ;;  %v169_v55 = vmax.f32 %v242_v40, %v167_v53  ;;  %v181_v56 = vmax.f32 %v244_v52, %v167_v53 }
 0x11b   :  { %v170_v57 = vsel %vm127_vm5, %v168_v54, 0.0  ;;  %v171_v58 = vsel %vm129_vm4, %v169_v55, 0.0 }
 0x11c   :  { %v172_v59 = vadd.f32 %v171_v58, %v170_v57 }
 0x11e   :  { %v173_v60 = vrot.slane %v172_v59, 4 }
 0x120   :  { %v174_v61 = vadd.f32 %v173_v60, %v172_v59 }
 0x121   :  { %v246_v62 = vpop.eup %245 }
 0x122   :  { %v165_v63 = vmul.f32 0.6931472, %v246_v62  ;;  %v175_v0 = vrot.slane %v174_v61, 2  ;;  %v248_v7 = vpop.eup %247 }
 0x124   :  { %v166_v1 = vsub.f32 %v165_v63, %v163_v43  ;;  %v176_v2 = vadd.f32 %v175_v0, %v174_v61 }
 0x126   :  { %v186_v3 = vsel %vm127_vm5, %v166_v1, 0.0  ;;  %v177_v4 = vrot.slane %v176_v2, 1 }
 0x127   :  { %187 = vadd.xlane.f32.xlu0 %v186_v3 }
 0x128   :  { %v178_v5 = vadd.f32 %v177_v4, %v176_v2 }
 0x12a   :  { %v183_v6 = vsub.f32 %v178_v5, %v181_v56 }
 0x12c   :  { %v184_v8 = vmul.f32 %v248_v7, %v183_v6 }
 0x12e   :  { %v185_v9 = vmul.f32 9.2103405, %v184_v8 }
 0x130   :  { %v189_v10 = vsel %vm127_vm5, %v185_v9, 0.0 }
 0x131   :  { %190 = vadd.xlane.f32.xlu0 %v189_v10 }
 0x1b4   :  { %v188_v11 = vpop.xlane.xlu0 %187 }
 0x1be   :  { %v191_v12 = vpop.xlane.xlu0 %190 }
 0x1bf   :  { %v193_v13 = vsel %vm192_vm8, %v188_v11, %v191_v12 }
 0x1c0   :  { %195 = vst.msk [vmem:[%s299_s2] sm:$0x3] %vm194_vm9, %v193_v13 }

</bundles_post_ra>
